<compile_context>
chip_gen: v7x
topology: tpu7x:2x2x1
jax: 0.10.0
libtpu: 0.0.40
codegen_flags: <defaults>
</compile_context>

<pallas_src>
import functools

import jax
import jax.numpy as jnp
from jax.experimental import pallas as pl
from jax.experimental.pallas import tpu as pltpu

LANES = 128
SUBLANES = 8
CHUNK_ROWS = 512          # rows per in-kernel compute chunk (256 KiB in f32)


def _round_up(x, m):
    return ((x + m - 1) // m) * m


def _default_num_cores():
    """2 on chips exposing 2 TensorCores per device (v4/v5p/v7x), else 1."""
    try:
        kind = jax.devices()[0].device_kind.lower()
    except Exception:
        return 1
    if any(tag in kind for tag in ("v4", "v5p", "v7")):
        return 2
    return 1


def _dice_partial_kernel(p_ref, t_ref, acc_ref, *, tile_rows, chunk_rows,
                         steps_per_core, full_rows, tail_lanes):
    """Accumulate (intersection, sum_pred, sum_true) partials into acc_ref.

    acc_ref is the resident (1, 3, 8, 128) f32 output block; grid is
    (num_cores, steps_per_core) with the core axis 'parallel'.  The input
    block is processed in fixed (chunk_rows, 128) sub-chunks so the f32
    intermediates stay chunk-sized no matter how large the DMA tile is.
    """
    c = pl.program_id(0)
    i = pl.program_id(1)
    blk = c * steps_per_core + i                  # logical (unclamped) block id

    @pl.when(i == 0)
    def _():
        acc_ref[...] = jnp.zeros_like(acc_ref)

    n_chunks = tile_rows // chunk_rows

    def load_chunk(ci):
        start = pl.multiple_of(ci * chunk_rows, chunk_rows)
        x = p_ref[pl.ds(start, chunk_rows), :].astype(jnp.float32)
        t = t_ref[pl.ds(start, chunk_rows), :].astype(jnp.float32)
        # sigmoid(x) == 0.5*tanh(0.5*x) + 0.5 : tanh runs on the EUP slot,
        # saving the rcp+Newton VALU ops of a full-precision divide.
        p = 0.5 * jnp.tanh(0.5 * x) + 0.5
        return p, t

    def fold(x):
        # (chunk_rows, 128) -> (8, 128): leading-dim split at the native
        # sublane tile; pure VALU add tree, no cross-lane work.
        return x.reshape(chunk_rows // SUBLANES, SUBLANES, LANES).sum(axis=0)

    def accumulate(p, t):
        acc_ref[0, 0] += fold(p * t)              # intersection
        acc_ref[0, 1] += fold(p)                  # sum(sigmoid(y_pred))
        acc_ref[0, 2] += fold(t)                  # sum(y_true)

    # Blocks entirely inside the valid region need no masking (common case).
    fully_valid = (blk + 1) * tile_rows <= full_rows

    @pl.when(fully_valid)
    def _():
        def body(ci, carry):
            p, t = load_chunk(ci)
            accumulate(p, t)
            return carry
        jax.lax.fori_loop(0, n_chunks, body, 0, unroll=True)

    @pl.when(jnp.logical_not(fully_valid))
    def _():
        # Tail / clamped-duplicate block: mask zero-padding (sigmoid(0)=0.5
        # would bias sum_pred) and out-of-bounds garbage rows.  jnp.where
        # selects, so garbage NaN/Inf never propagates.
        def body(ci, carry):
            p, t = load_chunk(ci)
            row = (jax.lax.broadcasted_iota(jnp.int32, (chunk_rows, LANES), 0)
                   + blk * tile_rows + ci * chunk_rows)
            valid = row < full_rows
            if tail_lanes:
                lane = jax.lax.broadcasted_iota(jnp.int32, (chunk_rows, LANES), 1)
                valid = valid | ((row == full_rows) & (lane < tail_lanes))
            zero = jnp.zeros_like(p)
            accumulate(jnp.where(valid, p, zero), jnp.where(valid, t, zero))
            return carry
        jax.lax.fori_loop(0, n_chunks, body, 0, unroll=True)


def dice_loss(y_pred, y_true, smooth=1e-6, tile_rows=None, num_cores=None):
    """Pallas implementation of DiceLoss.forward(y_pred, y_true)."""
    assert y_pred.size == y_true.size
    n = int(y_pred.size)
    p = y_pred.reshape(-1)                        # keep native dtype (bf16 ok)
    t = y_true.reshape(-1)

    # Pad only to the next multiple of 128 (<= 127 elems, rare path); padded
    # elements are masked out inside the kernel.
    # TODO(synk): handle the partial last row fully in-kernel (1-D BlockSpec)
    # to avoid this extra HBM copy on the ragged path.
    pad = (-n) % LANES
    if pad:
        p = jnp.pad(p, (0, pad))
        t = jnp.pad(t, (0, pad))
    rows = (n + pad) // LANES
    p = p.reshape(rows, LANES)
    t = t.reshape(rows, LANES)

    if num_cores is None:
        num_cores = _default_num_cores()
    num_cores = max(1, int(num_cores))

    # Row alignment: 8 for 32-bit dtypes, 16 for bf16, 32 for int8 (packing).
    min_item = min(p.dtype.itemsize, t.dtype.itemsize)
    row_align = SUBLANES * max(1, 4 // max(1, min_item))
    bytes_per_row = LANES * (p.dtype.itemsize + t.dtype.itemsize)

    if tile_rows is None:
        # ~8 MiB of fresh input bytes per grid step: large enough to amortize
        # the ~0.35us per-step overhead near the HBM roofline, small enough
        # that double-buffered inputs + chunk intermediates fit v7x's 64 MiB.
        target = max(CHUNK_ROWS,
                     ((8 << 20) // bytes_per_row) // CHUNK_ROWS * CHUNK_ROWS)
    else:
        target = _round_up(int(tile_rows), row_align)

    rows_padded = _round_up(rows, row_align)
    tm = min(target, rows_padded)
    chunk = _round_up(min(CHUNK_ROWS, tm), row_align)
    tm = _round_up(tm, chunk)

    nblocks = int(pl.cdiv(rows, tm))
    steps_per_core = int(pl.cdiv(nblocks, num_cores))

    def idx_map(c, i):
        # Clamp so the (at most one) extra block on the last core stays
        # in-bounds; its contribution is fully masked out in the kernel.
        return (jnp.minimum(c * steps_per_core + i, nblocks - 1), 0)

    in_spec = pl.BlockSpec((tm, LANES), idx_map)
    out_spec = pl.BlockSpec((1, 3, SUBLANES, LANES), lambda c, i: (c, 0, 0, 0))

    # Explicit VMEM budget: 2 inputs x 2 buffers x block + chunk intermediates
    # and output blocks, capped below v7x's 64 MiB per-TC physical VMEM.
    block_bytes = tm * LANES * (p.dtype.itemsize + t.dtype.itemsize)
    vmem_limit = int(min(max(2 * block_bytes + (16 << 20), 24 << 20), 56 << 20))

    cost = pl.CostEstimate(
        flops=7 * n,
        transcendentals=n,
        bytes_accessed=n * (p.dtype.itemsize + t.dtype.itemsize)
        + num_cores * 3 * SUBLANES * LANES * 4,
    )

    partials = pl.pallas_call(
        functools.partial(
            _dice_partial_kernel,
            tile_rows=tm,
            chunk_rows=chunk,
            steps_per_core=steps_per_core,
            full_rows=n // LANES,
            tail_lanes=n % LANES),
        out_shape=jax.ShapeDtypeStruct((num_cores, 3, SUBLANES, LANES),
                                       jnp.float32),
        grid_spec=pltpu.PrefetchScalarGridSpec(
            num_scalar_prefetch=0,
            grid=(num_cores, steps_per_core),
            in_specs=[in_spec, in_spec],
            out_specs=out_spec,
        ),
        compiler_params=pltpu.CompilerParams(
            dimension_semantics=("parallel", "arbitrary"),
            vmem_limit_bytes=vmem_limit),
        cost_estimate=cost,
    )(p, t)

    # Tiny final reduction + dice in the wrapper (combines per-core partials).
    sums = jnp.sum(partials, axis=(0, 2, 3))      # (3,)
    dice = (2.0 * sums[0] + smooth) / (sums[1] + sums[2] + smooth)
    return 1.0 - dice


def dice_loss_ref(y_pred, y_true, smooth=1e-6):
    """Plain-JAX reference matching the PyTorch module exactly."""
    p = jax.nn.sigmoid(y_pred.astype(jnp.float32))
    t = y_true.astype(jnp.float32)
    inter = jnp.sum(p * t)
    dice = (2.0 * inter + smooth) / (jnp.sum(p) + jnp.sum(t) + smooth)
    return 1.0 - dice


if __name__ == "__main__":
    key = jax.random.PRNGKey(0)
    k1, k2, k3, k4 = jax.random.split(key, 4)

    # Case 1: 3D-UNet-style volume (N, C, D, H, W), f32 logits, default tiling.
    shape = (2, 1, 16, 16, 16)
    y_pred = jax.random.normal(k1, shape, dtype=jnp.float32)
    y_true = (jax.random.uniform(k2, shape) > 0.5).astype(jnp.float32)

    ref = dice_loss_ref(y_pred, y_true)
    loss = jax.block_until_ready(dice_loss(y_pred, y_true))
    assert jnp.allclose(loss, ref, rtol=1e-5, atol=1e-6), (loss, ref)

    # Case 2: tiny tiles -> multi-step accumulation across the grid.
    loss2 = jax.block_until_ready(dice_loss(y_pred, y_true, tile_rows=16))
    assert jnp.allclose(loss2, ref, rtol=1e-5, atol=1e-6), (loss2, ref)

    # Case 3: ragged element count (not a multiple of 128) -> in-kernel tail mask.
    shape3 = (1, 3, 7, 9, 11)
    yp3 = jax.random.normal(k3, shape3, dtype=jnp.float32)
    yt3 = (jax.random.uniform(k4, shape3) > 0.5).astype(jnp.float32)
    ref3 = dice_loss_ref(yp3, yt3)
    loss3 = jax.block_until_ready(dice_loss(yp3, yt3))
    assert jnp.allclose(loss3, ref3, rtol=1e-5, atol=1e-6), (loss3, ref3)

    # Case 4: bf16 logits AND bf16 mask stream natively (no wrapper upcast).
    yp_bf16 = y_pred.astype(jnp.bfloat16)
    yt_bf16 = y_true.astype(jnp.bfloat16)
    ref4 = dice_loss_ref(yp_bf16, yt_bf16)
    loss4 = jax.block_until_ready(dice_loss(yp_bf16, yt_bf16))
    assert jnp.allclose(loss4, ref4, rtol=1e-4, atol=1e-5), (loss4, ref4)

    # Case 5: force num_cores=2 with odd block count -> clamped duplicate block
    # path (fully masked) on the second core.
    loss5 = jax.block_until_ready(
        dice_loss(y_pred, y_true, tile_rows=24, num_cores=2))
    assert jnp.allclose(loss5, ref, rtol=1e-5, atol=1e-6), (loss5, ref)

    print("KERNEL_OK")
</pallas_src>

<mosaic_0001>
module attributes {stable_mosaic.version = 11 : i64} {
  func.func @_dice_partial_kernel(%arg0: i32, %arg1: i32, %arg2: memref<64x128xf32, #tpu.memory_space<vmem>>, %arg3: memref<64x128xf32, #tpu.memory_space<vmem>>, %arg4: memref<1x3x8x128xf32, #tpu.memory_space<vmem>>) attributes {dimension_semantics = [#tpu.dimension_semantics<parallel>, #tpu.dimension_semantics<arbitrary>], iteration_bounds = array<i64: 1, 1>, scalar_prefetch = 0 : i64, scratch_operands = 0 : i64, tpu.core_type = #tpu.core_type<tc>, window_params = [{transform_indices = @transform_0, window_bounds = array<i64: 64, 128>}, {transform_indices = @transform_1, window_bounds = array<i64: 64, 128>}, {transform_indices = @transform_2, window_bounds = array<i64: 1, 3, 8, 128>}]} {
    %c1_i32 = arith.constant 1 : i32
    %0 = arith.muli %arg0, %c1_i32 : i32
    %1 = arith.addi %0, %arg1 : i32
    %c0_i32 = arith.constant 0 : i32
    %2 = arith.cmpi eq, %arg1, %c0_i32 : i32
    %3 = arith.extui %2 : i1 to i32
    %c0_i32_0 = arith.constant 0 : i32
    %4 = arith.cmpi ne, %3, %c0_i32_0 : i32
    scf.if %4 {
      %cst = arith.constant 0.000000e+00 : f32
      %13 = vector.broadcast %cst : f32 to vector<1x3x8x128xf32>
      %c0 = arith.constant 0 : index
      %c0_5 = arith.constant 0 : index
      %c0_6 = arith.constant 0 : index
      %c0_7 = arith.constant 0 : index
      %14 = vector.load %arg4[%c0, %c0_5, %c0_6, %c0_7] : memref<1x3x8x128xf32, #tpu.memory_space<vmem>>, vector<1x3x8x128xf32>
      tpu.vector_store %arg4[%c0, %c0_5, %c0_6, %c0_7], %13 {strides = array<i32>} : memref<1x3x8x128xf32, #tpu.memory_space<vmem>>, vector<1x3x8x128xf32>,
    } else {
    }
    %c1_i32_1 = arith.constant 1 : i32
    %5 = arith.addi %1, %c1_i32_1 : i32
    %c64_i32 = arith.constant 64 : i32
    %6 = arith.muli %5, %c64_i32 : i32
    %c64_i32_2 = arith.constant 64 : i32
    %7 = arith.cmpi sle, %6, %c64_i32_2 : i32
    %8 = arith.extui %7 : i1 to i32
    %c0_i32_3 = arith.constant 0 : i32
    %9 = arith.cmpi ne, %8, %c0_i32_3 : i32
    scf.if %9 {
      %c0_i32_5 = arith.constant 0 : i32
      %c64_i32_6 = arith.constant 64 : i32
      %13 = arith.muli %c0_i32_5, %c64_i32_6 : i32
      %14 = tpu.assume_multiple %13, 64 : i32
      %15 = arith.index_cast %14 : i32 to index
      %c0 = arith.constant 0 : index
      %16 = vector.load %arg2[%15, %c0] : memref<64x128xf32, #tpu.memory_space<vmem>>, vector<64x128xf32>
      %17 = arith.index_cast %14 : i32 to index
      %c0_7 = arith.constant 0 : index
      %18 = vector.load %arg3[%17, %c0_7] : memref<64x128xf32, #tpu.memory_space<vmem>>, vector<64x128xf32>
      %cst = arith.constant 5.000000e-01 : f32
      %19 = vector.broadcast %cst : f32 to vector<64x128xf32>
      %20 = arith.mulf %19, %16 : vector<64x128xf32>
      %21 = math.tanh %20 : vector<64x128xf32>
      %cst_8 = arith.constant 5.000000e-01 : f32
      %22 = vector.broadcast %cst_8 : f32 to vector<64x128xf32>
      %23 = arith.mulf %22, %21 : vector<64x128xf32>
      %cst_9 = arith.constant 5.000000e-01 : f32
      %24 = vector.broadcast %cst_9 : f32 to vector<64x128xf32>
      %25 = arith.addf %23, %24 : vector<64x128xf32>
      %c0_10 = arith.constant 0 : index
      %c0_11 = arith.constant 0 : index
      %c0_12 = arith.constant 0 : index
      %c0_13 = arith.constant 0 : index
      %26 = vector.load %arg4[%c0_10, %c0_11, %c0_12, %c0_13] : memref<1x3x8x128xf32, #tpu.memory_space<vmem>>, vector<1x1x8x128xf32>
      %27 = vector.shape_cast %26 : vector<1x1x8x128xf32> to vector<8x128xf32>
      %28 = arith.mulf %25, %18 : vector<64x128xf32>
      %29 = vector.shape_cast %28 : vector<64x128xf32> to vector<8x8x128xf32>
      %cst_14 = arith.constant dense<0.000000e+00> : vector<8x128xf32>
      %30 = vector.multi_reduction <add>, %29, %cst_14 [0] : vector<8x8x128xf32> to vector<8x128xf32>
      %31 = arith.addf %27, %30 : vector<8x128xf32>
      %c0_15 = arith.constant 0 : index
      %c0_16 = arith.constant 0 : index
      %c0_17 = arith.constant 0 : index
      %c0_18 = arith.constant 0 : index
      %32 = vector.load %arg4[%c0_15, %c0_16, %c0_17, %c0_18] : memref<1x3x8x128xf32, #tpu.memory_space<vmem>>, vector<1x1x8x128xf32>
      %33 = vector.shape_cast %32 : vector<1x1x8x128xf32> to vector<8x128xf32>
      %34 = vector.shape_cast %31 : vector<8x128xf32> to vector<1x1x8x128xf32>
      tpu.vector_store %arg4[%c0_15, %c0_16, %c0_17, %c0_18], %34 {strides = array<i32>} : memref<1x3x8x128xf32, #tpu.memory_space<vmem>>, vector<1x1x8x128xf32>,
      %c0_19 = arith.constant 0 : index
      %c1 = arith.constant 1 : index
      %c0_20 = arith.constant 0 : index
      %c0_21 = arith.constant 0 : index
      %35 = vector.load %arg4[%c0_19, %c1, %c0_20, %c0_21] : memref<1x3x8x128xf32, #tpu.memory_space<vmem>>, vector<1x1x8x128xf32>
      %36 = vector.shape_cast %35 : vector<1x1x8x128xf32> to vector<8x128xf32>
      %37 = vector.shape_cast %25 : vector<64x128xf32> to vector<8x8x128xf32>
      %cst_22 = arith.constant dense<0.000000e+00> : vector<8x128xf32>
      %38 = vector.multi_reduction <add>, %37, %cst_22 [0] : vector<8x8x128xf32> to vector<8x128xf32>
      %39 = arith.addf %36, %38 : vector<8x128xf32>
      %c0_23 = arith.constant 0 : index
      %c1_24 = arith.constant 1 : index
      %c0_25 = arith.constant 0 : index
      %c0_26 = arith.constant 0 : index
      %40 = vector.load %arg4[%c0_23, %c1_24, %c0_25, %c0_26] : memref<1x3x8x128xf32, #tpu.memory_space<vmem>>, vector<1x1x8x128xf32>
      %41 = vector.shape_cast %40 : vector<1x1x8x128xf32> to vector<8x128xf32>
      %42 = vector.shape_cast %39 : vector<8x128xf32> to vector<1x1x8x128xf32>
      tpu.vector_store %arg4[%c0_23, %c1_24, %c0_25, %c0_26], %42 {strides = array<i32>} : memref<1x3x8x128xf32, #tpu.memory_space<vmem>>, vector<1x1x8x128xf32>,
      %c0_27 = arith.constant 0 : index
      %c2 = arith.constant 2 : index
      %c0_28 = arith.constant 0 : index
      %c0_29 = arith.constant 0 : index
      %43 = vector.load %arg4[%c0_27, %c2, %c0_28, %c0_29] : memref<1x3x8x128xf32, #tpu.memory_space<vmem>>, vector<1x1x8x128xf32>
      %44 = vector.shape_cast %43 : vector<1x1x8x128xf32> to vector<8x128xf32>
      %45 = vector.shape_cast %18 : vector<64x128xf32> to vector<8x8x128xf32>
      %cst_30 = arith.constant dense<0.000000e+00> : vector<8x128xf32>
      %46 = vector.multi_reduction <add>, %45, %cst_30 [0] : vector<8x8x128xf32> to vector<8x128xf32>
      %47 = arith.addf %44, %46 : vector<8x128xf32>
      %c0_31 = arith.constant 0 : index
      %c2_32 = arith.constant 2 : index
      %c0_33 = arith.constant 0 : index
      %c0_34 = arith.constant 0 : index
      %48 = vector.load %arg4[%c0_31, %c2_32, %c0_33, %c0_34] : memref<1x3x8x128xf32, #tpu.memory_space<vmem>>, vector<1x1x8x128xf32>
      %49 = vector.shape_cast %48 : vector<1x1x8x128xf32> to vector<8x128xf32>
      %50 = vector.shape_cast %47 : vector<8x128xf32> to vector<1x1x8x128xf32>
      tpu.vector_store %arg4[%c0_31, %c2_32, %c0_33, %c0_34], %50 {strides = array<i32>} : memref<1x3x8x128xf32, #tpu.memory_space<vmem>>, vector<1x1x8x128xf32>,
      %c1_i32_35 = arith.constant 1 : i32
    } else {
    }
    %true = arith.constant true
    %10 = arith.xori %7, %true : i1
    %11 = arith.extui %10 : i1 to i32
    %c0_i32_4 = arith.constant 0 : i32
    %12 = arith.cmpi ne, %11, %c0_i32_4 : i32
    scf.if %12 {
      %c0_i32_5 = arith.constant 0 : i32
      %c64_i32_6 = arith.constant 64 : i32
      %13 = arith.muli %c0_i32_5, %c64_i32_6 : i32
      %14 = tpu.assume_multiple %13, 64 : i32
      %15 = arith.index_cast %14 : i32 to index
      %c0 = arith.constant 0 : index
      %16 = vector.load %arg2[%15, %c0] : memref<64x128xf32, #tpu.memory_space<vmem>>, vector<64x128xf32>
      %17 = arith.index_cast %14 : i32 to index
      %c0_7 = arith.constant 0 : index
      %18 = vector.load %arg3[%17, %c0_7] : memref<64x128xf32, #tpu.memory_space<vmem>>, vector<64x128xf32>
      %cst = arith.constant 5.000000e-01 : f32
      %19 = vector.broadcast %cst : f32 to vector<64x128xf32>
      %20 = arith.mulf %19, %16 : vector<64x128xf32>
      %21 = math.tanh %20 : vector<64x128xf32>
      %cst_8 = arith.constant 5.000000e-01 : f32
      %22 = vector.broadcast %cst_8 : f32 to vector<64x128xf32>
      %23 = arith.mulf %22, %21 : vector<64x128xf32>
      %cst_9 = arith.constant 5.000000e-01 : f32
      %24 = vector.broadcast %cst_9 : f32 to vector<64x128xf32>
      %25 = arith.addf %23, %24 : vector<64x128xf32>
      %26 = tpu.iota {dimensions = array<i32: 0>} : vector<64x128xi32>
      %c64_i32_10 = arith.constant 64 : i32
      %27 = arith.muli %1, %c64_i32_10 : i32
      %28 = vector.broadcast %27 : i32 to vector<64x128xi32>
      %29 = arith.addi %26, %28 : vector<64x128xi32>
      %c64_i32_11 = arith.constant 64 : i32
      %30 = arith.muli %c0_i32_5, %c64_i32_11 : i32
      %31 = vector.broadcast %30 : i32 to vector<64x128xi32>
      %32 = arith.addi %29, %31 : vector<64x128xi32>
      %c64_i32_12 = arith.constant 64 : i32
      %33 = vector.broadcast %c64_i32_12 : i32 to vector<64x128xi32>
      %34 = arith.cmpi slt, %32, %33 : vector<64x128xi32>
      %cst_13 = arith.constant 0.000000e+00 : f32
      %35 = vector.broadcast %cst_13 : f32 to vector<64x128xf32>
      %36 = arith.select %34, %25, %35 : vector<64x128xi1>, vector<64x128xf32>
      %37 = arith.select %34, %18, %35 : vector<64x128xi1>, vector<64x128xf32>
      %c0_14 = arith.constant 0 : index
      %c0_15 = arith.constant 0 : index
      %c0_16 = arith.constant 0 : index
      %c0_17 = arith.constant 0 : index
      %38 = vector.load %arg4[%c0_14, %c0_15, %c0_16, %c0_17] : memref<1x3x8x128xf32, #tpu.memory_space<vmem>>, vector<1x1x8x128xf32>
      %39 = vector.shape_cast %38 : vector<1x1x8x128xf32> to vector<8x128xf32>
      %40 = arith.mulf %36, %37 : vector<64x128xf32>
      %41 = vector.shape_cast %40 : vector<64x128xf32> to vector<8x8x128xf32>
      %cst_18 = arith.constant dense<0.000000e+00> : vector<8x128xf32>
      %42 = vector.multi_reduction <add>, %41, %cst_18 [0] : vector<8x8x128xf32> to vector<8x128xf32>
      %43 = arith.addf %39, %42 : vector<8x128xf32>
      %c0_19 = arith.constant 0 : index
      %c0_20 = arith.constant 0 : index
      %c0_21 = arith.constant 0 : index
      %c0_22 = arith.constant 0 : index
      %44 = vector.load %arg4[%c0_19, %c0_20, %c0_21, %c0_22] : memref<1x3x8x128xf32, #tpu.memory_space<vmem>>, vector<1x1x8x128xf32>
      %45 = vector.shape_cast %44 : vector<1x1x8x128xf32> to vector<8x128xf32>
      %46 = vector.shape_cast %43 : vector<8x128xf32> to vector<1x1x8x128xf32>
      tpu.vector_store %arg4[%c0_19, %c0_20, %c0_21, %c0_22], %46 {strides = array<i32>} : memref<1x3x8x128xf32, #tpu.memory_space<vmem>>, vector<1x1x8x128xf32>,
      %c0_23 = arith.constant 0 : index
      %c1 = arith.constant 1 : index
      %c0_24 = arith.constant 0 : index
      %c0_25 = arith.constant 0 : index
      %47 = vector.load %arg4[%c0_23, %c1, %c0_24, %c0_25] : memref<1x3x8x128xf32, #tpu.memory_space<vmem>>, vector<1x1x8x128xf32>
      %48 = vector.shape_cast %47 : vector<1x1x8x128xf32> to vector<8x128xf32>
      %49 = vector.shape_cast %36 : vector<64x128xf32> to vector<8x8x128xf32>
      %cst_26 = arith.constant dense<0.000000e+00> : vector<8x128xf32>
      %50 = vector.multi_reduction <add>, %49, %cst_26 [0] : vector<8x8x128xf32> to vector<8x128xf32>
      %51 = arith.addf %48, %50 : vector<8x128xf32>
      %c0_27 = arith.constant 0 : index
      %c1_28 = arith.constant 1 : index
      %c0_29 = arith.constant 0 : index
      %c0_30 = arith.constant 0 : index
      %52 = vector.load %arg4[%c0_27, %c1_28, %c0_29, %c0_30] : memref<1x3x8x128xf32, #tpu.memory_space<vmem>>, vector<1x1x8x128xf32>
      %53 = vector.shape_cast %52 : vector<1x1x8x128xf32> to vector<8x128xf32>
      %54 = vector.shape_cast %51 : vector<8x128xf32> to vector<1x1x8x128xf32>
      tpu.vector_store %arg4[%c0_27, %c1_28, %c0_29, %c0_30], %54 {strides = array<i32>} : memref<1x3x8x128xf32, #tpu.memory_space<vmem>>, vector<1x1x8x128xf32>,
      %c0_31 = arith.constant 0 : index
      %c2 = arith.constant 2 : index
      %c0_32 = arith.constant 0 : index
      %c0_33 = arith.constant 0 : index
      %55 = vector.load %arg4[%c0_31, %c2, %c0_32, %c0_33] : memref<1x3x8x128xf32, #tpu.memory_space<vmem>>, vector<1x1x8x128xf32>
      %56 = vector.shape_cast %55 : vector<1x1x8x128xf32> to vector<8x128xf32>
      %57 = vector.shape_cast %37 : vector<64x128xf32> to vector<8x8x128xf32>
      %cst_34 = arith.constant dense<0.000000e+00> : vector<8x128xf32>
      %58 = vector.multi_reduction <add>, %57, %cst_34 [0] : vector<8x8x128xf32> to vector<8x128xf32>
      %59 = arith.addf %56, %58 : vector<8x128xf32>
      %c0_35 = arith.constant 0 : index
      %c2_36 = arith.constant 2 : index
      %c0_37 = arith.constant 0 : index
      %c0_38 = arith.constant 0 : index
      %60 = vector.load %arg4[%c0_35, %c2_36, %c0_37, %c0_38] : memref<1x3x8x128xf32, #tpu.memory_space<vmem>>, vector<1x1x8x128xf32>
      %61 = vector.shape_cast %60 : vector<1x1x8x128xf32> to vector<8x128xf32>
      %62 = vector.shape_cast %59 : vector<8x128xf32> to vector<1x1x8x128xf32>
      tpu.vector_store %arg4[%c0_35, %c2_36, %c0_37, %c0_38], %62 {strides = array<i32>} : memref<1x3x8x128xf32, #tpu.memory_space<vmem>>, vector<1x1x8x128xf32>,
      %c1_i32_39 = arith.constant 1 : i32
    } else {
    }
    return
  }
  func.func @transform_0(%arg0: i32, %arg1: i32) -> (i32, i32) {
    %c1_i32 = arith.constant 1 : i32
    %0 = arith.muli %arg0, %c1_i32 : i32
    %1 = arith.addi %0, %arg1 : i32
    %c0_i32 = arith.constant 0 : i32
    %2 = arith.minsi %1, %c0_i32 : i32
    %c0_i32_0 = arith.constant 0 : i32
    %c0_i32_1 = arith.constant 0 : i32
    return %2, %c0_i32_0 : i32, i32
  }
  func.func @transform_1(%arg0: i32, %arg1: i32) -> (i32, i32) {
    %c1_i32 = arith.constant 1 : i32
    %0 = arith.muli %arg0, %c1_i32 : i32
    %1 = arith.addi %0, %arg1 : i32
    %c0_i32 = arith.constant 0 : i32
    %2 = arith.minsi %1, %c0_i32 : i32
    %c0_i32_0 = arith.constant 0 : i32
    %c0_i32_1 = arith.constant 0 : i32
    return %2, %c0_i32_0 : i32, i32
  }
  func.func @transform_2(%arg0: i32, %arg1: i32) -> (i32, i32, i32, i32) {
    %c0_i32 = arith.constant 0 : i32
    %c0_i32_0 = arith.constant 0 : i32
    %c0_i32_1 = arith.constant 0 : i32
    %c0_i32_2 = arith.constant 0 : i32
    return %arg0, %c0_i32, %c0_i32_0, %c0_i32_1 : i32, i32, i32, i32
  }
}

</mosaic_0001>

<bundles_post_ra>
// kernel: tpu_custom_call.1
= control target key start
LH: loop header
LB: loop body
LE: loop exit
PB: predicated region body
PF: predicated region fallthrough
CT: control target
= control target key end

     0   :  { %7 = vsyncpa [#allocation3], 0  ;;  %s478_s0 = inlined_call_operand.hbm [shape: f32[64,128], index: 0, kind: input, shape index: {}]   ;;  %s479_s1 = inlined_call_operand.hbm [shape: f32[64,128], index: 1, kind: input, shape index: {}]   ;;  %s480_s2 = inlined_call_operand.hbm [shape: f32[1,3,8,128], index: 2, kind: output, shape index: {}]  }
   0x1   :  { %8 = vsyncpa [#allocation6], 0 }
   0x2   :  { %9 = vsyncpa [#allocation4], 0  ;;  %s413_s9 = smov [#allocation2]   ;;  %s341_s13 = scalar_lea.hbm %s478_s0, 1024 }
   0x3   :  { %s21_s10 = sshll.u32 %s413_s9, 4  ;;  %p342_p0 = scmp.ne.s32.totalorder %s478_s0, %s341_s13  ;;  %s22_s10 = int_to_ptr.vmem [resolvable:$true] %s21_s10 }
   0x4   :  { %p345_p1 = scmp.lt.u32.totalorder %s341_s13, %s478_s0 }
   0x6   :  { %p347_p2 = pnand %p345_p1, %p342_p0 }
   0x8   :  { %350 = shalt.err (!%p347_p2)
}
   0x9   :  { %s351_s18 = scalar_lea.vmem %s22_s10, 1024  ;;  %p356_p4 = scmp.lt.s32.totalorder %s22_s10, %s22_s10 }
   0xa   :  { %p352_p3 = scmp.ne.s32.totalorder %s22_s10, %s351_s18  ;;  %p357_p5 = scmp.lt.s32.totalorder %s351_s18, %s351_s18 }
   0xc   :  { %p358_p6 = por %p357_p5, %p356_p4 }
   0xe   :  { %p359_p7 = pnand %p358_p6, %p352_p3 }
  0x10   :  { %362 = shalt.err (!%p359_p7)
}
  0x11   :  { %s414_s19 = smov 128   ;;  %s415_s20 = smov 8  }
  0x12   :  { %27 = dma.hbm_to_vmem [thread:$0]  %s478_s0, 1024, %s22_s10, [#allocation3], %s414_s19, %s414_s19, %s415_s20  }
  0x13   :  { %s416_s23 = smov [#allocation5]   ;;  %s363_s27 = scalar_lea.hbm %s479_s1, 1024 }
  0x14   :  { %s39_s24 = sshll.u32 %s416_s23, 4  ;;  %p364_p8 = scmp.ne.s32.totalorder %s479_s1, %s363_s27  ;;  %s40_s24 = int_to_ptr.vmem [resolvable:$true] %s39_s24 }
  0x15   :  { %p367_p9 = scmp.lt.u32.totalorder %s363_s27, %s479_s1 }
  0x17   :  { %p369_p10 = pnand %p367_p9, %p364_p8 }
  0x19   :  { %372 = shalt.err (!%p369_p10)
}
  0x1a   :  { %s373_s4 = scalar_lea.vmem %s40_s24, 1024  ;;  %p378_p12 = scmp.lt.s32.totalorder %s40_s24, %s40_s24 }
  0x1b   :  { %p374_p11 = scmp.ne.s32.totalorder %s40_s24, %s373_s4  ;;  %p379_p13 = scmp.lt.s32.totalorder %s373_s4, %s373_s4 }
  0x1d   :  { %p380_p0 = por %p379_p13, %p378_p12 }
  0x1f   :  { %p381_p1 = pnand %p380_p0, %p374_p11 }
  0x21   :  { %384 = shalt.err (!%p381_p1)
}
  0x22   :  { %45 = dma.hbm_to_vmem [thread:$0]  %s479_s1, 1024, %s40_s24, [#allocation6], %s414_s19, %s414_s19, %s415_s20  }
  0x23   :  { %407 = dma.done.wait [#allocation3], 1024  }
  0x24   :  { %408 = vsyncadd [#allocation3], 4294966272 }
  0x25   :  { %409 = dma.done.wait [#allocation6], 1024  }
  0x26   :  { %410 = vsyncadd [#allocation6], 4294966272  ;;  %v74_v0 = vld [vmem:[#allocation2] sm:$0xff]  ;;  %v75_v1 = vld [vmem:[#allocation2 + $0x8] sm:$0xff]  ;;  %s417_s1 = smov [#allocation7]  }
  0x27   :  { %v76_v2 = vld [vmem:[#allocation2 + $0x10] sm:$0xff]  ;;  %v77_v3 = vld [vmem:[#allocation2 + $0x18] sm:$0xff]  ;;  %v78_v4 = vld [vmem:[#allocation2 + $0x20] sm:$0xff]  ;;  %v90_v6 = vmul.f32 0.5, %v74_v0  ;;  %v91_v7 = vmul.f32 0.5, %v75_v1  ;;  %s302_s6 = sshll.u32 %s417_s1, 4  ;;  %s303_s6 = int_to_ptr.vmem [resolvable:$true] %s302_s6 }
  0x28   :  { %v79_v5 = vld [vmem:[#allocation2 + $0x28] sm:$0xff]  ;;  %v92_v8 = vmul.f32 0.5, %v76_v2  ;;  %v80_v9 = vld [vmem:[#allocation2 + $0x30] sm:$0xff]  ;;  %v93_v10 = vmul.f32 0.5, %v77_v3  ;;  %v81_v11 = vld [vmem:[#allocation2 + $0x38] sm:$0xff]  ;;  %v94_v14 = vmul.f32 0.5, %v78_v4  ;;  %p390_p3 = scmp.lt.s32.totalorder %s303_s6, %s303_s6 }
  0x29   :  { %v82_v12 = vld [vmem:[#allocation5] sm:$0xff]  ;;  %v83_v13 = vld [vmem:[#allocation5 + $0x8] sm:$0xff]  ;;  %325 = vtanh.f32 %v90_v6  ;;  %v95_v15 = vmul.f32 0.5, %v79_v5  ;;  %v84_v17 = vld [vmem:[#allocation5 + $0x10] sm:$0xff]  ;;  %v96_v18 = vmul.f32 0.5, %v80_v9  ;;  %v97_v19 = vmul.f32 0.5, %v81_v11 }
  0x2a   :  { %327 = vtanh.f32 %v91_v7  ;;  %v153_v16 = vadd.f32 %v83_v13, %v82_v12  ;;  %v85_v21 = vld [vmem:[#allocation5 + $0x18] sm:$0xff]  ;;  %v86_v23 = vld [vmem:[#allocation5 + $0x20] sm:$0xff]  ;;  %v87_v25 = vld [vmem:[#allocation5 + $0x28] sm:$0xff]  ;;  %s385_s7 = scalar_lea.vmem %s303_s6, 384 }
  0x2b   :  { %329 = vtanh.f32 %v92_v8  ;;  %v88_v28 = vld [vmem:[#allocation5 + $0x30] sm:$0xff]  ;;  %v89_v33 = vld [vmem:[#allocation5 + $0x38] sm:$0xff]  ;;  %p386_p2 = scmp.ne.s32.totalorder %s303_s6, %s385_s7  ;;  %p391_p4 = scmp.lt.s32.totalorder %s385_s7, %s385_s7 }
  0x2c   :  { %331 = vtanh.f32 %v93_v10  ;;  %v154_v20 = vadd.f32 %v153_v16, %v84_v17 }
  0x2d   :  { %333 = vtanh.f32 %v94_v14  ;;  %p392_p5 = por %p391_p4, %p390_p3 }
  0x2e   :  { %335 = vtanh.f32 %v95_v15  ;;  %v155_v22 = vadd.f32 %v154_v20, %v85_v21 }
  0x2f   :  { %337 = vtanh.f32 %v96_v18  ;;  %p393_p6 = pnand %p392_p5, %p386_p2 }
  0x30   :  { %339 = vtanh.f32 %v97_v19  ;;  %v156_v24 = vadd.f32 %v155_v22, %v86_v23 }
  0x32   :  { %v157_v26 = vadd.f32 %v156_v24, %v87_v25 }
  0x33   :  { %v326_v27 = vpop.eup %325 }
  0x34   :  { %v328_v29 = vpop.eup %327  ;;  %v106_v30 = vmul.f32 0.5, %v326_v27  ;;  %v158_v31 = vadd.f32 %v157_v26, %v88_v28 }
  0x35   :  { %v330_v32 = vpop.eup %329  ;;  %v107_v34 = vmul.f32 0.5, %v328_v29 }
  0x36   :  { %v332_v35 = vpop.eup %331  ;;  %v108_v36 = vmul.f32 0.5, %v330_v32  ;;  %v114_v37 = vadd.f32 0.5, %v106_v30  ;;  %v159_v38 = vadd.f32 %v158_v31, %v89_v33 }
  0x37   :  { %v334_v39 = vpop.eup %333  ;;  %v109_v40 = vmul.f32 0.5, %v332_v35  ;;  %v115_v41 = vadd.f32 0.5, %v107_v34 }
  0x38   :  { %v336_v42 = vpop.eup %335  ;;  %v110_v43 = vmul.f32 0.5, %v334_v39  ;;  %v116_v44 = vadd.f32 0.5, %v108_v36  ;;  %v123_v45 = vmul.f32 %v114_v37, %v82_v12  ;;  %161 = vst [vmem:[#allocation7 + $0x10] sm:$0xff] %v159_v38 }
  0x39   :  { %v338_v46 = vpop.eup %337  ;;  %v111_v47 = vmul.f32 0.5, %v336_v42  ;;  %v117_v48 = vadd.f32 0.5, %v109_v40  ;;  %v124_v49 = vmul.f32 %v115_v41, %v83_v13  ;;  %v142_v50 = vadd.f32 %v115_v41, %v114_v37 }
  0x3a   :  { %v340_v51 = vpop.eup %339  ;;  %v112_v52 = vmul.f32 0.5, %v338_v46  ;;  %v118_v53 = vadd.f32 0.5, %v110_v43  ;;  %v125_v54 = vmul.f32 %v116_v44, %v84_v17 }
  0x3b   :  { %v113_v55 = vmul.f32 0.5, %v340_v51  ;;  %v119_v56 = vadd.f32 0.5, %v111_v47  ;;  %v126_v57 = vmul.f32 %v117_v48, %v85_v21  ;;  %v131_v58 = vadd.f32 %v124_v49, %v123_v45 }
  0x3c   :  { %v143_v59 = vadd.f32 %v142_v50, %v116_v44  ;;  %v120_v60 = vadd.f32 0.5, %v112_v52  ;;  %v127_v61 = vmul.f32 %v118_v53, %v86_v23 }
  0x3d   :  { %v132_v62 = vadd.f32 %v131_v58, %v125_v54  ;;  %v121_v0 = vadd.f32 0.5, %v113_v55  ;;  %v128_v1 = vmul.f32 %v119_v56, %v87_v25 }
  0x3e   :  { %v144_v63 = vadd.f32 %v143_v59, %v117_v48  ;;  %v129_v4 = vmul.f32 %v120_v60, %v88_v28 }
  0x3f   :  { %v133_v2 = vadd.f32 %v132_v62, %v126_v57  ;;  %v130_v7 = vmul.f32 %v121_v0, %v89_v33 }
  0x40   :  { %v145_v3 = vadd.f32 %v144_v63, %v118_v53 }
  0x41   :  { %v134_v5 = vadd.f32 %v133_v2, %v127_v61 }
  0x42   :  { %v146_v6 = vadd.f32 %v145_v3, %v119_v56 }
  0x43   :  { %v135_v8 = vadd.f32 %v134_v5, %v128_v1 }
  0x44   :  { %v147_v9 = vadd.f32 %v146_v6, %v120_v60 }
  0x45   :  { %v136_v10 = vadd.f32 %v135_v8, %v129_v4 }
  0x46   :  { %v148_v11 = vadd.f32 %v147_v9, %v121_v0 }
  0x47   :  { %v137_v12 = vadd.f32 %v136_v10, %v130_v7 }
  0x48   :  { %150 = vst [vmem:[#allocation7 + $0x8] sm:$0xff] %v148_v11 }
  0x49   :  { %139 = vst [vmem:[#allocation7] sm:$0xff] %v137_v12 }
  0x4a   :  { %396 = shalt.err (!%p393_p6)
}
  0x4b   :  { %s397_s10 = scalar_lea.hbm %s480_s2, 384 }
  0x4c   :  { %p398_p7 = scmp.ne.s32.totalorder %s480_s2, %s397_s10  ;;  %p401_p8 = scmp.lt.u32.totalorder %s397_s10, %s480_s2 }
  0x4e   :  { %p403_p9 = pnand %p401_p8, %p398_p7 }
  0x50   :  { %406 = shalt.err (!%p403_p9)
}
  0x51   :  { %308 = dma.vmem_to_hbm [thread:$0]  %s303_s6, 384, %s480_s2, [#allocation4], %s414_s19, %s414_s19, %s415_s20  }
  0x52   :  { %411 = dma.done.wait [#allocation4], 384  }
  0x53   :  { %412 = vsyncadd [#allocation4], 4294966912 }
  0x54   :  { %312 = vsyncpa [#allocation3], 1 }
  0x55   :  { %313 = vsyncpa [#allocation6], 1 }
  0x56   :  { %314 = vsyncpa [#allocation4], 1 }

</bundles_post_ra>
